<compile_context>
chip_gen: v7x
topology: tpu7x:2x2x1
jax: 0.10.0
libtpu: 0.0.40
codegen_flags: <defaults>
</compile_context>

<pallas_src>
import functools
import inspect
import math

import jax
import jax.numpy as jnp
from jax.experimental import pallas as pl
from jax.experimental.pallas import tpu as pltpu


def _round_up(x, m):
    return ((x + m - 1) // m) * m


def _supports_pipeline_mode():
    try:
        return hasattr(pl, "Buffered") and (
            "pipeline_mode" in inspect.signature(pl.BlockSpec).parameters
        )
    except (TypeError, ValueError):
        return False


_SUPPORTS_PIPELINE_MODE = _supports_pipeline_mode()


def _spec(shape, index_map, *, buffers=None):
    """BlockSpec helper: buffers=1 marks a resident (single-buffered) constant block."""
    if buffers is not None and _SUPPORTS_PIPELINE_MODE:
        return pl.BlockSpec(shape, index_map, pipeline_mode=pl.Buffered(buffer_count=buffers))
    return pl.BlockSpec(shape, index_map)


def timestep_embedder_kernel(t_ref, freqs_ref, w1_ref, b1_ref, w2_ref, b2_ref, o_ref):
    """One (row-tile, col-tile) grid step of the fused sinusoidal-embed + MLP.

    t_ref:     (TN, 1)       f32   timestep column
    freqs_ref: (1, half)     f32   sinusoid frequencies (resident)
    w1_ref:    (2*half, Hp)  bf16  layer-1 weight, (in, out) layout (resident)
    b1_ref:    (1, Hp)       f32   layer-1 bias (resident)
    w2_ref:    (Hp, TC)      bf16  layer-2 weight column tile
    b2_ref:    (1, TC)       f32   layer-2 bias column tile
    o_ref:     (TN, TC)            output tile
    """
    args = t_ref[...] * freqs_ref[...]                                    # (TN, half) f32
    # [cos | sin] along lanes (half == 128 -> lane-aligned placement, no XLU shuffle),
    # then a single K = 2*half = 256 matmul that fills the 256-deep MXU on v6e/v7x.
    emb = jnp.concatenate([jnp.cos(args), jnp.sin(args)], axis=-1).astype(w1_ref.dtype)

    h = jnp.dot(emb, w1_ref[...], preferred_element_type=jnp.float32) + b1_ref[...]
    # SiLU with one EUP op: sigmoid(x) = 0.5*tanh(0.5*x) + 0.5 (f32 accumulator).
    h = h * (0.5 * jnp.tanh(0.5 * h) + 0.5)

    out = jnp.dot(h.astype(w2_ref.dtype), w2_ref[...], preferred_element_type=jnp.float32)
    o_ref[...] = (out + b2_ref[...]).astype(o_ref.dtype)


def prepare_timestep_embedder_params(w1, b1, w2, b2, *, weight_dtype=jnp.bfloat16):
    """One-time parameter prep (do this at init, NOT per call).

    Pads hidden to a lane-dense multiple of 128 and casts weights to bf16 so the per-call
    path does no weight reformatting / extra HBM traffic. Weights are (in, out) layout.
    Returns ((w1_p, b1_p, w2_p, b2_p), hidden).
    """
    in1, hidden = w1.shape
    hp = max(128, _round_up(hidden, 128))
    w1_p = jnp.zeros((in1, hp), weight_dtype).at[:, :hidden].set(w1.astype(weight_dtype))
    w2_p = jnp.zeros((hp, hp), weight_dtype).at[:hidden, :hidden].set(w2.astype(weight_dtype))
    b1_p = jnp.zeros((1, hp), jnp.float32).at[0, :hidden].set(b1.astype(jnp.float32))
    b2_p = jnp.zeros((1, hp), jnp.float32).at[0, :hidden].set(b2.astype(jnp.float32))
    return (w1_p, b1_p, w2_p, b2_p), hidden


def _choose_row_tile(n, block_n):
    """Largest power-of-two row tile (>=8, <=block_n) with bounded padding waste."""
    n8 = _round_up(max(n, 1), 8)
    tn = min(block_n, 1 << max(3, (n8 - 1).bit_length()))
    while tn > 8:
        if _round_up(n, tn) - n < max(tn // 4, 8):
            return tn
        tn //= 2
    return 8


def _choose_col_tile(hp, w2_budget_bytes=8 << 20):
    """Bound the bf16 W2 column tile so it fits comfortably in VMEM on every generation."""
    tc = hp
    while tc > 128 and hp * tc * 2 > w2_budget_bytes and (tc // 2) % 128 == 0:
        tc //= 2
    return tc


@functools.partial(
    jax.jit,
    static_argnames=("hidden", "frequency_embedding_size", "max_period", "block_n",
                     "out_dtype"),
)
def timestep_embedder(t, w1_p, b1_p, w2_p, b2_p, *, hidden,
                      frequency_embedding_size=256, max_period=10000,
                      block_n=256, out_dtype=jnp.float32):
    """t: (N,) possibly-fractional timesteps. Params must come from
    prepare_timestep_embedder_params (pre-padded bf16 weights / f32 biases).
    Returns (N, hidden) in out_dtype."""
    assert frequency_embedding_size % 2 == 0, "odd frequency_embedding_size not supported"
    # TODO(synk): the dim % 2 zero-pad branch of timestep_embedding is unreachable for the
    # default (even) frequency_embedding_size and is not implemented here.
    n = t.shape[0]
    half = frequency_embedding_size // 2
    hp = w1_p.shape[1]
    assert w1_p.shape[0] == 2 * half and w2_p.shape == (hp, hp)

    tn = _choose_row_tile(n, block_n)
    n_pad = _round_up(n, tn)
    grid_n = n_pad // tn
    tc = _choose_col_tile(hp)
    grid_c = hp // tc

    # Frequency table is constant-folded under jit.
    freqs = jnp.exp(
        -math.log(max_period) * jnp.arange(half, dtype=jnp.float32) / half
    ).reshape(1, half)

    t_col = jnp.zeros((n_pad, 1), jnp.float32).at[:n, 0].set(t.astype(jnp.float32))

    # W2/b2 are only constant (hence single-buffered) when there is a single column tile.
    w2_buffers = 1 if grid_c == 1 else None
    w2_nbuf = 1 if grid_c == 1 else 2

    vmem_est = (2 * tn * 4 + half * 4 + 2 * half * hp * 2 + hp * 4
                + w2_nbuf * (hp * tc * 2 + tc * 4) + 2 * tn * tc * 4
                + tn * (2 * half) * 2 + 2 * tn * hp * 4)
    vmem_limit = min(64 << 20, max(32 << 20, int(1.5 * vmem_est)))

    cost = pl.CostEstimate(
        flops=2 * n_pad * grid_c * (2 * half) * hp + 2 * n_pad * hp * hp,
        transcendentals=n_pad * grid_c * (2 * half + hp),
        bytes_accessed=(n_pad * 4 + half * 4 + 2 * half * hp * 2 + hp * 4
                        + hp * hp * 2 + hp * 4
                        + n_pad * hp * jnp.dtype(out_dtype).itemsize),
    )

    out = pl.pallas_call(
        timestep_embedder_kernel,
        out_shape=jax.ShapeDtypeStruct((n_pad, hp), out_dtype),
        grid=(grid_n, grid_c),
        in_specs=[
            _spec((tn, 1), lambda i, j: (i, 0)),                       # t tile (pipelined)
            _spec((1, half), lambda i, j: (0, 0), buffers=1),          # freqs (resident)
            _spec((2 * half, hp), lambda i, j: (0, 0), buffers=1),     # W1 (resident)
            _spec((1, hp), lambda i, j: (0, 0), buffers=1),            # b1 (resident)
            _spec((hp, tc), lambda i, j: (0, j), buffers=w2_buffers),  # W2 column tile
            _spec((1, tc), lambda i, j: (0, j), buffers=w2_buffers),   # b2 column tile
        ],
        out_specs=pl.BlockSpec((tn, tc), lambda i, j: (i, j)),         # lane-dense output
        compiler_params=pltpu.CompilerParams(
            dimension_semantics=("parallel", "parallel"),
            vmem_limit_bytes=vmem_limit,
        ),
        cost_estimate=cost,
    )(t_col, freqs, w1_p, b1_p, w2_p, b2_p)

    return out[:n, :hidden]


def reference_forward(t, w1, b1, w2, b2, *, frequency_embedding_size=256, max_period=10000):
    """Pure-JAX reference mirroring the PyTorch module, with the same documented
    bf16-MXU / f32-accumulation casts as the kernel."""
    half = frequency_embedding_size // 2
    freqs = jnp.exp(-math.log(max_period) * jnp.arange(half, dtype=jnp.float32) / half)
    args = t.astype(jnp.float32)[:, None] * freqs[None]
    emb = jnp.concatenate([jnp.cos(args), jnp.sin(args)], axis=-1)
    h = jnp.dot(emb.astype(jnp.bfloat16), w1.astype(jnp.bfloat16),
                preferred_element_type=jnp.float32) + b1
    h = h * jax.nn.sigmoid(h)
    return jnp.dot(h.astype(jnp.bfloat16), w2.astype(jnp.bfloat16),
                   preferred_element_type=jnp.float32) + b2


if __name__ == "__main__":
    hidden_size = 32
    frequency_embedding_size = 256
    N = 8

    key = jax.random.PRNGKey(0)
    k_t, k_w1, k_b1, k_w2, k_b2 = jax.random.split(key, 5)

    # Deterministic synthetic parameters, (in, out) layout, matching
    # nn.Linear(256, H) and nn.Linear(H, H).
    w1 = (jax.random.normal(k_w1, (frequency_embedding_size, hidden_size), jnp.float32)
          / math.sqrt(frequency_embedding_size))
    b1 = jax.random.normal(k_b1, (hidden_size,), jnp.float32) * 0.01
    w2 = (jax.random.normal(k_w2, (hidden_size, hidden_size), jnp.float32)
          / math.sqrt(hidden_size))
    b2 = jax.random.normal(k_b2, (hidden_size,), jnp.float32) * 0.01

    # 1-D tensor of N (possibly fractional) timesteps.
    t = jax.random.uniform(k_t, (N,), jnp.float32, minval=0.0, maxval=1000.0)

    # One-time parameter prep (pad + bf16 cast) -- hoisted out of the per-call path.
    params, hidden = prepare_timestep_embedder_params(w1, b1, w2, b2)
    params = jax.block_until_ready(params)

    out = timestep_embedder(t, *params, hidden=hidden,
                            frequency_embedding_size=frequency_embedding_size)
    out = jax.block_until_ready(out)

    ref = reference_forward(t, w1, b1, w2, b2,
                            frequency_embedding_size=frequency_embedding_size)
    assert out.shape == (N, hidden_size)
    max_err = float(jnp.max(jnp.abs(out - ref)))
    assert jnp.allclose(out, ref, atol=2e-3, rtol=2e-3), max_err

    print("KERNEL_OK")
</pallas_src>

<mosaic_0001>
module attributes {stable_mosaic.version = 11 : i64} {
  func.func @timestep_embedder_kernel(%arg0: i32, %arg1: i32, %arg2: memref<8x1xf32, #tpu.memory_space<vmem>>, %arg3: memref<1x128xf32, #tpu.memory_space<vmem>>, %arg4: memref<256x128xbf16, #tpu.memory_space<vmem>>, %arg5: memref<1x128xf32, #tpu.memory_space<vmem>>, %arg6: memref<128x128xbf16, #tpu.memory_space<vmem>>, %arg7: memref<1x128xf32, #tpu.memory_space<vmem>>, %arg8: memref<8x128xf32, #tpu.memory_space<vmem>>) attributes {dimension_semantics = [#tpu.dimension_semantics<parallel>, #tpu.dimension_semantics<parallel>], iteration_bounds = array<i64: 1, 1>, scalar_prefetch = 0 : i64, scratch_operands = 0 : i64, tpu.core_type = #tpu.core_type<tc>, window_params = [{transform_indices = @transform_0, window_bounds = array<i64: 8, 1>}, {pipeline_mode = #tpu.pipeline_mode<synchronous>, transform_indices = @transform_1, window_bounds = array<i64: 1, 128>}, {pipeline_mode = #tpu.pipeline_mode<synchronous>, transform_indices = @transform_2, window_bounds = array<i64: 256, 128>}, {pipeline_mode = #tpu.pipeline_mode<synchronous>, transform_indices = @transform_3, window_bounds = array<i64: 1, 128>}, {pipeline_mode = #tpu.pipeline_mode<synchronous>, transform_indices = @transform_4, window_bounds = array<i64: 128, 128>}, {pipeline_mode = #tpu.pipeline_mode<synchronous>, transform_indices = @transform_5, window_bounds = array<i64: 1, 128>}, {transform_indices = @transform_6, window_bounds = array<i64: 8, 128>}]} {
    %c0 = arith.constant 0 : index
    %c0_0 = arith.constant 0 : index
    %0 = vector.load %arg2[%c0, %c0_0] : memref<8x1xf32, #tpu.memory_space<vmem>>, vector<8x1xf32>
    %c0_1 = arith.constant 0 : index
    %c0_2 = arith.constant 0 : index
    %1 = vector.load %arg3[%c0_1, %c0_2] : memref<1x128xf32, #tpu.memory_space<vmem>>, vector<1x128xf32>
    %2 = vector.broadcast %0 : vector<8x1xf32> to vector<8x128xf32>
    %3 = vector.broadcast %1 : vector<1x128xf32> to vector<8x128xf32>
    %4 = arith.mulf %2, %3 : vector<8x128xf32>
    %5 = math.cos %4 : vector<8x128xf32>
    %6 = math.sin %4 : vector<8x128xf32>
    %7 = tpu.concatenate %5, %6 in 1 : vector<8x128xf32>, vector<8x128xf32> -> vector<8x256xf32>
    %8 = arith.truncf %7 : vector<8x256xf32> to vector<8x256xbf16>
    %c0_3 = arith.constant 0 : index
    %c0_4 = arith.constant 0 : index
    %9 = vector.load %arg4[%c0_3, %c0_4] : memref<256x128xbf16, #tpu.memory_space<vmem>>, vector<256x128xbf16>
    %cst = arith.constant dense<0.000000e+00> : vector<8x128xf32>
    %10 = tpu.matmul %8, %9, %cst {dimension_numbers = #tpu.dot_dimension_numbers<[1], [0], [0], [1], [0, 0, 1, 1], [], []>} : vector<8x256xbf16>, vector<256x128xbf16>, vector<8x128xf32> -> vector<8x128xf32>
    %c0_5 = arith.constant 0 : index
    %c0_6 = arith.constant 0 : index
    %11 = vector.load %arg5[%c0_5, %c0_6] : memref<1x128xf32, #tpu.memory_space<vmem>>, vector<1x128xf32>
    %12 = vector.broadcast %11 : vector<1x128xf32> to vector<8x128xf32>
    %13 = arith.addf %10, %12 : vector<8x128xf32>
    %cst_7 = arith.constant 5.000000e-01 : f32
    %14 = vector.broadcast %cst_7 : f32 to vector<8x128xf32>
    %15 = arith.mulf %14, %13 : vector<8x128xf32>
    %16 = math.tanh %15 : vector<8x128xf32>
    %cst_8 = arith.constant 5.000000e-01 : f32
    %17 = vector.broadcast %cst_8 : f32 to vector<8x128xf32>
    %18 = arith.mulf %17, %16 : vector<8x128xf32>
    %cst_9 = arith.constant 5.000000e-01 : f32
    %19 = vector.broadcast %cst_9 : f32 to vector<8x128xf32>
    %20 = arith.addf %18, %19 : vector<8x128xf32>
    %21 = arith.mulf %13, %20 : vector<8x128xf32>
    %22 = arith.truncf %21 : vector<8x128xf32> to vector<8x128xbf16>
    %c0_10 = arith.constant 0 : index
    %c0_11 = arith.constant 0 : index
    %23 = vector.load %arg6[%c0_10, %c0_11] : memref<128x128xbf16, #tpu.memory_space<vmem>>, vector<128x128xbf16>
    %cst_12 = arith.constant dense<0.000000e+00> : vector<8x128xf32>
    %24 = tpu.matmul %22, %23, %cst_12 {dimension_numbers = #tpu.dot_dimension_numbers<[1], [0], [0], [1], [0, 0, 1, 1], [], []>} : vector<8x128xbf16>, vector<128x128xbf16>, vector<8x128xf32> -> vector<8x128xf32>
    %c0_13 = arith.constant 0 : index
    %c0_14 = arith.constant 0 : index
    %25 = vector.load %arg7[%c0_13, %c0_14] : memref<1x128xf32, #tpu.memory_space<vmem>>, vector<1x128xf32>
    %26 = vector.broadcast %25 : vector<1x128xf32> to vector<8x128xf32>
    %27 = arith.addf %24, %26 : vector<8x128xf32>
    %c0_15 = arith.constant 0 : index
    %c0_16 = arith.constant 0 : index
    %28 = vector.load %arg8[%c0_15, %c0_16] : memref<8x128xf32, #tpu.memory_space<vmem>>, vector<8x128xf32>
    tpu.vector_store %arg8[%c0_15, %c0_16], %27 {strides = array<i32>} : memref<8x128xf32, #tpu.memory_space<vmem>>, vector<8x128xf32>,
    return
  }
  func.func @transform_0(%arg0: i32, %arg1: i32) -> (i32, i32) {
    %c0_i32 = arith.constant 0 : i32
    %c0_i32_0 = arith.constant 0 : i32
    return %arg0, %c0_i32 : i32, i32
  }
  func.func @transform_1(%arg0: i32, %arg1: i32) -> (i32, i32) {
    %c0_i32 = arith.constant 0 : i32
    %c0_i32_0 = arith.constant 0 : i32
    %c0_i32_1 = arith.constant 0 : i32
    return %c0_i32, %c0_i32_0 : i32, i32
  }
  func.func @transform_2(%arg0: i32, %arg1: i32) -> (i32, i32) {
    %c0_i32 = arith.constant 0 : i32
    %c0_i32_0 = arith.constant 0 : i32
    %c0_i32_1 = arith.constant 0 : i32
    return %c0_i32, %c0_i32_0 : i32, i32
  }
  func.func @transform_3(%arg0: i32, %arg1: i32) -> (i32, i32) {
    %c0_i32 = arith.constant 0 : i32
    %c0_i32_0 = arith.constant 0 : i32
    %c0_i32_1 = arith.constant 0 : i32
    return %c0_i32, %c0_i32_0 : i32, i32
  }
  func.func @transform_4(%arg0: i32, %arg1: i32) -> (i32, i32) {
    %c0_i32 = arith.constant 0 : i32
    %c0_i32_0 = arith.constant 0 : i32
    return %c0_i32, %arg1 : i32, i32
  }
  func.func @transform_5(%arg0: i32, %arg1: i32) -> (i32, i32) {
    %c0_i32 = arith.constant 0 : i32
    %c0_i32_0 = arith.constant 0 : i32
    return %c0_i32, %arg1 : i32, i32
  }
  func.func @transform_6(%arg0: i32, %arg1: i32) -> (i32, i32) {
    %c0_i32 = arith.constant 0 : i32
    return %arg0, %arg1 : i32, i32
  }
}

</mosaic_0001>

<bundles_post_ra>
// kernel: timestep_embedder.1
= control target key start
LH: loop header
LB: loop body
LE: loop exit
PB: predicated region body
PF: predicated region fallthrough
CT: control target
= control target key end

     0   :  { %11 = vsyncpa [#allocation3], 0  ;;  %s919_s0 = inlined_call_operand.vmem [shape: f32[8,1], index: 0, kind: input, shape index: {}]   ;;  %s920_s1 = inlined_call_operand.vmem [shape: f32[1,128], index: 1, kind: input, shape index: {}]   ;;  %s921_s2 = inlined_call_operand.hbm [shape: bf16[256,128], index: 2, kind: input, shape index: {}]   ;;  %s922_s3 = inlined_call_operand.vmem [shape: f32[1,128], index: 3, kind: input, shape index: {}]   ;;  %s923_s4 = inlined_call_operand.hbm [shape: bf16[128,128], index: 4, kind: input, shape index: {}]   ;;  %s924_s5 = inlined_call_operand.vmem [shape: f32[1,128], index: 5, kind: input, shape index: {}]   ;;  %s925_s6 = inlined_call_operand.hbm [shape: f32[8,128], index: 6, kind: output, shape index: {}]  }
   0x1   :  { %12 = vsyncpa [#allocation6], 0 }
   0x2   :  { %13 = vsyncpa [#allocation4], 0  ;;  %s792_s21 = smov [#allocation2]   ;;  %s720_s25 = scalar_lea.hbm %s921_s2, 2048 }
   0x3   :  { %s23_s22 = sshll.u32 %s792_s21, 4  ;;  %p721_p0 = scmp.ne.s32.totalorder %s921_s2, %s720_s25  ;;  %s24_s22 = int_to_ptr.vmem [resolvable:$true] %s23_s22 }
   0x4   :  { %p724_p1 = scmp.lt.u32.totalorder %s720_s25, %s921_s2 }
   0x6   :  { %p726_p2 = pnand %p724_p1, %p721_p0 }
   0x8   :  { %729 = shalt.err (!%p726_p2)
}
   0x9   :  { %s730_s30 = scalar_lea.vmem %s24_s22, 2048  ;;  %p735_p4 = scmp.lt.s32.totalorder %s24_s22, %s24_s22 }
   0xa   :  { %p731_p3 = scmp.ne.s32.totalorder %s24_s22, %s730_s30  ;;  %p736_p5 = scmp.lt.s32.totalorder %s730_s30, %s730_s30 }
   0xc   :  { %p737_p6 = por %p736_p5, %p735_p4 }
   0xe   :  { %p738_p7 = pnand %p737_p6, %p731_p3 }
  0x10   :  { %741 = shalt.err (!%p738_p7)
}
  0x11   :  { %s793_s7 = smov 64   ;;  %s794_s8 = smov 4  }
  0x12   :  { %29 = dma.hbm_to_vmem [thread:$0]  %s921_s2, 2048, %s24_s22, [#allocation3], %s793_s7, %s793_s7, %s794_s8  }
  0x13   :  { %s795_s11 = smov [#allocation5]   ;;  %s742_s15 = scalar_lea.hbm %s923_s4, 1024 }
  0x14   :  { %s37_s12 = sshll.u32 %s795_s11, 4  ;;  %p743_p8 = scmp.ne.s32.totalorder %s923_s4, %s742_s15  ;;  %s38_s12 = int_to_ptr.vmem [resolvable:$true] %s37_s12 }
  0x15   :  { %p746_p9 = scmp.lt.u32.totalorder %s742_s15, %s923_s4 }
  0x17   :  { %p748_p10 = pnand %p746_p9, %p743_p8 }
  0x19   :  { %751 = shalt.err (!%p748_p10)
}
  0x1a   :  { %s752_s20 = scalar_lea.vmem %s38_s12, 1024  ;;  %p757_p12 = scmp.lt.s32.totalorder %s38_s12, %s38_s12 }
  0x1b   :  { %p753_p11 = scmp.ne.s32.totalorder %s38_s12, %s752_s20  ;;  %p758_p13 = scmp.lt.s32.totalorder %s752_s20, %s752_s20 }
  0x1d   :  { %p759_p0 = por %p758_p13, %p757_p12 }
  0x1f   :  { %p760_p1 = pnand %p759_p0, %p753_p11 }
  0x21   :  { %763 = shalt.err (!%p760_p1)
}
  0x22   :  { %43 = dma.hbm_to_vmem [thread:$0]  %s923_s4, 1024, %s38_s12, [#allocation6], %s793_s7, %s793_s7, %s794_s8  }
  0x23   :  { %786 = dma.done.wait [#allocation3], 2048  }
  0x24   :  { %787 = vsyncadd [#allocation3], 4294965248 }
  0x25   :  { %788 = dma.done.wait [#allocation6], 1024  }
  0x26   :  { %789 = vsyncadd [#allocation6], 4294966272  ;;  %v796_v0 = vmov 0   ;;  %v53_v1 = vld [vmem:[%s919_s0] sm:$0xff]  ;;  %v692_v4 = vld [vmem:[#allocation2 + $0x48] sm:$0xff]   ;;  %v797_v19 = vmov 0.0  }
  0x27   :  { %689 = vset.pattern.permute.xlu0 %v796_v0  ;;  %v690_v2 = vld [vmem:[#allocation2 + $0x40] sm:$0xff]   ;;  %v693_v5 = vld [vmem:[#allocation2 + $0x8] sm:$0xff]   ;;  %v694_v6 = vld [vmem:[#allocation2 + $0x50] sm:$0xff]   ;;  %651 = vmatprep.subr.bf16.mxu1 %v797_v19  ;;  %v798_v34 = vmov 2102212464   ;;  %s805_s27 = smov [#allocation7]  }
  0x28   :  { %57 = vperm.xlu0 %689, %v53_v1   ;;  %v691_v3 = vld [vmem:[#allocation2] sm:$0xff]   ;;  %620 = vmatprep.subr.bf16.mxu0 %v690_v2  ;;  %v695_v7 = vld [vmem:[#allocation2 + $0x10] sm:$0xff]   ;;  %v696_v8 = vld [vmem:[#allocation2 + $0x58] sm:$0xff]   ;;  %v799_v36 = vmov 920167782   ;;  %s575_s28 = sshll.u32 %s805_s27, 4  ;;  %s576_s28 = int_to_ptr.vmem [resolvable:$true] %s575_s28 }
  0x29   :  { %621 = vmatpush3.bf16.msra.mxu0 %v691_v3  ;;  %v697_v9 = vld [vmem:[#allocation2 + $0x18] sm:$0xff]   ;;  %v698_v10 = vld [vmem:[#allocation2 + $0x60] sm:$0xff]   ;;  %v700_v12 = vld [vmem:[#allocation2 + $0x68] sm:$0xff]   ;;  %v800_v40 = vmov 1326507024   ;;  %p769_p3 = scmp.lt.s32.totalorder %s576_s28, %s576_s28 }
  0x2a   :  { %622 = vmatprep.subr.bf16.mxu0 %v692_v4  ;;  %v699_v11 = vld [vmem:[#allocation2 + $0x20] sm:$0xff]   ;;  %v701_v13 = vld [vmem:[#allocation2 + $0x28] sm:$0xff]   ;;  %v702_v14 = vld [vmem:[#allocation2 + $0x70] sm:$0xff]   ;;  %v801_v42 = vmov 683565275  }
  0x2b   :  { %v703_v15 = vld [vmem:[#allocation2 + $0x30] sm:$0xff]   ;;  %v704_v16 = vld [vmem:[#allocation2 + $0x78] sm:$0xff]   ;;  %v706_v18 = vld [vmem:[#allocation5] sm:$0xff]   ;;  %v802_v44 = vmov 2475754826  }
  0x2c   :  { %v705_v17 = vld [vmem:[#allocation2 + $0x38] sm:$0xff]   ;;  %652 = vmatpush3.bf16.msra.mxu1 %v706_v18  ;;  %v585_v20 = vld [vmem:[%s920_s1] ss:$0 sm:$0xff]  ;;  %v803_v47 = vmov 2131351028  }
  0x2d   :  { %623 = vmatpush3.bf16.msra.mxu0 %v693_v5  ;;  %653 = vmatprep.subr.bf16.mxu1 %v797_v19 }
  0x2e   :  { %624 = vmatprep.subr.bf16.mxu0 %v694_v6 }
  0x31   :  { %625 = vmatpush3.bf16.msra.mxu0 %v695_v7 }
  0x32   :  { %626 = vmatprep.subr.bf16.mxu0 %v696_v8 }
  0x35   :  { %627 = vmatpush3.bf16.msra.mxu0 %v697_v9 }
  0x36   :  { %628 = vmatprep.subr.bf16.mxu0 %v698_v10 }
  0x39   :  { %629 = vmatpush3.bf16.msra.mxu0 %v699_v11 }
  0x3a   :  { %630 = vmatprep.subr.bf16.mxu0 %v700_v12 }
  0x3d   :  { %631 = vmatpush3.bf16.msra.mxu0 %v701_v13 }
  0x3e   :  { %632 = vmatprep.subr.bf16.mxu0 %v702_v14 }
  0x41   :  { %633 = vmatpush3.bf16.msra.mxu0 %v703_v15 }
  0x42   :  { %634 = vmatprep.subr.bf16.mxu0 %v704_v16 }
  0x45   :  { %635 = vmatpush3.bf16.msra.mxu0 %v705_v17 }
  0xa7   :  { %v58_v21 = vpop.permute.xlu0 %57 }
  0xa8   :  { %v873_v22 = vmul.f32 %v585_v20, %v58_v21 }
  0xaa   :  { %v70_v23 = vand.u32 2139095040, %v873_v22  ;;  %v67_v24 = vand.u32 2147483647, %v873_v22  ;;  %vm69_vm7 = vcmp.lt.s32.totalorder %v873_v22, 0  ;;  %vm159_vm15 = vweird.f32 %v873_v22 }
  0xac   :  { %v71_v25 = vshrl.u32 %v70_v23, 23  ;;  %v74_v27 = vand.u32 8388607, %v67_v24  ;;  %vm68_vm8 = vcmp.le.f32.partialorder %v67_v24, 0.7853982 }
  0xae   :  { %v586_v26 = vadd.s32 4294967169, %v71_v25  ;;  %v75_v30 = vor.u32 8388608, %v74_v27 }
  0xb0   :  { %v77_v28 = vadd.s32 1, %v586_v26  ;;  %v115_v38 = vshll.u32 %v75_v30, 8 }
  0xb2   :  { %vm78_vm0 = vcmp.gt.s32.totalorder %v77_v28, 0 }
  0xb3   :  { %v79_v29 = vsel %vm78_vm0, %v77_v28, 0  ;;  %vm804_vm0 = vmmov 0  }
  0xb4   :  { %v81_v31 = vand.u32 31, %v79_v29  ;;  %v80_v32 = vshrl.u32 %v79_v29, 5  ;;  %667 = vmatprep.mubr.msk.bf16.mxu1 %vm804_vm0, %v797_v19 }
  0xb6   :  { %v82_v33 = vsub.s32 32, %v81_v31  ;;  %v93_v35 = vshll.u32 %v798_v34, %v81_v31  ;;  %v96_v37 = vshll.u32 %v799_v36, %v81_v31  ;;  %v84_v43 = vshll.u32 %v801_v42, %v81_v31 }
  0xb7   :  { %v87_v46 = vshll.u32 %v802_v44, %v81_v31  ;;  %v90_v49 = vshll.u32 %v803_v47, %v81_v31  ;;  %vm102_vm1 = vcmp.lt.s32.totalorder %v80_v32, 4  ;;  %vm99_vm2 = vcmp.lt.s32.totalorder %v80_v32, 1 }
  0xb8   :  { %v94_v39 = vshrl.u32 %v799_v36, %v82_v33  ;;  %v97_v41 = vshrl.u32 %v800_v40, %v82_v33  ;;  %v85_v45 = vshrl.u32 %v802_v44, %v82_v33  ;;  %v88_v48 = vshrl.u32 %v803_v47, %v82_v33 }
  0xb9   :  { %v91_v50 = vshrl.u32 %v798_v34, %v82_v33  ;;  %v83_v54 = vshrl.u32 %v801_v42, %v82_v33  ;;  %vm100_vm3 = vcmp.lt.s32.totalorder %v80_v32, 2  ;;  %vm101_vm4 = vcmp.lt.s32.totalorder %v80_v32, 3 }
  0xba   :  { %v95_v51 = vor.u32 %v94_v39, %v93_v35  ;;  %v98_v52 = vor.u32 %v97_v41, %v96_v37  ;;  %v86_v53 = vor.u32 %v85_v45, %v84_v43  ;;  %v89_v55 = vor.u32 %v88_v48, %v87_v46 }
  0xbb   :  { %v92_v56 = vor.u32 %v91_v50, %v90_v49 }
  0xbc   :  { %v108_v57 = vsel %vm102_vm1, %v95_v51, 920167782  ;;  %v112_v58 = vsel %vm102_vm1, %v98_v52, 1326507024  ;;  %v107_v60 = vsel %vm99_vm2, %v86_v53, %v89_v55  ;;  %v103_v63 = vsel %vm99_vm2, %v83_v54, %v86_v53 }
  0xbd   :  { %v104_v59 = vsel %vm102_vm1, %v92_v56, 2102212464  ;;  %v109_v61 = vsel %vm101_vm4, %v92_v56, %v108_v57  ;;  %v111_v62 = vsel %vm99_vm2, %v89_v55, %v92_v56  ;;  %v113_v2 = vsel %vm101_vm4, %v95_v51, %v112_v58 }
  0xbe   :  { %v105_v0 = vsel %vm101_vm4, %v89_v55, %v104_v59  ;;  %v110_v1 = vsel %vm100_vm3, %v107_v60, %v109_v61  ;;  %v114_v3 = vsel %vm100_vm3, %v111_v62, %v113_v2  ;;  %v707_v59 = vld [vmem:[#allocation5 + $0x8] sm:$0xff]   ;;  %v708_v60 = vld [vmem:[#allocation5 + $0x10] sm:$0xff]   ;;  %v709_v61 = vld [vmem:[#allocation5 + $0x18] sm:$0xff]  }
  0xbf   :  { %v879_v4 = vmul.u32.u64.low %v115_v38, %v110_v1  ;;  %v880_v5 = vmul.u32.u64.high %v115_v38, %v110_v1, %v879_v4  ;;  %v882_v6 = vmul.u32.u64.low %v115_v38, %v114_v3  ;;  %v883_v7 = vmul.u32.u64.high %v115_v38, %v114_v3, %v882_v6  ;;  %654 = vmatpush3.bf16.msra.mxu1 %v707_v59  ;;  %v711_v62 = vld [vmem:[#allocation5 + $0x28] sm:$0xff]   ;;  %v594_v2 = vld [vmem:[%s922_s3] ss:$0 sm:$0xff]  ;;  %s764_s3 = scalar_lea.vmem %s576_s28, 128 }
  0xc0   :  { %v106_v8 = vsel %vm100_vm3, %v103_v63, %v105_v0  ;;  %655 = vmatprep.subr.bf16.mxu1 %v797_v19  ;;  %v712_v63 = vld [vmem:[#allocation5 + $0x30] sm:$0xff]   ;;  %v713_v0 = vld [vmem:[#allocation5 + $0x38] sm:$0xff]   ;;  %p765_p2 = scmp.ne.s32.totalorder %s576_s28, %s764_s3  ;;  %p770_p4 = scmp.lt.s32.totalorder %s764_s3, %s764_s3 }
  0xc1   :  { %v125_v9 = vadd.s32 1, %v880_v5  ;;  %v122_v10 = vmul.u32 %v115_v38, %v106_v8  ;;  %vm124_vm5 = vc.u32 %v883_v7, %v879_v4  ;;  %v123_v25 = vadd.s32 %v879_v4, %v883_v7 }
  0xc2   :  { %p771_p5 = por %p770_p4, %p769_p3 }
  0xc3   :  { %v126_v11 = vsel %vm124_vm5, %v125_v9, %v880_v5  ;;  %656 = vmatpush3.bf16.msra.mxu1 %v708_v60 }
  0xc4   :  { %v127_v12 = vadd.s32 %v126_v11, %v122_v10  ;;  %657 = vmatprep.subr.bf16.mxu1 %v797_v19  ;;  %p772_p6 = pnand %p771_p5, %p765_p2 }
  0xc6   :  { %v128_v13 = vadd.s32 536870912, %v127_v12 }
  0xc7   :  { %658 = vmatpush3.bf16.msra.mxu1 %v709_v61 }
  0xc8   :  { %v129_v14 = vshrl.u32 %v128_v13, 30  ;;  %659 = vmatprep.subr.bf16.mxu1 %v797_v19 }
  0xca   :  { %v130_v15 = vshll.u32 %v129_v14, 30  ;;  %v153_v37 = vsub.s32 4, %v129_v14 }
  0xcc   :  { %v131_v16 = vsub.s32 %v127_v12, %v130_v15  ;;  %v154_v40 = vsel %vm69_vm7, %v153_v37, %v129_v14 }
  0xcd   :  { %v156_v42 = vsel %vm68_vm8, 0, %v154_v40 }
  0xce   :  { %v133_v17 = vsub.s32 0, %v131_v16  ;;  %v263_v43 = vadd.s32 3, %v156_v42  ;;  %v160_v44 = vand.u32 3, %v156_v42 }
  0xd0   :  { %v587_v18 = vmin.u32 %v133_v17, %v131_v16  ;;  %v264_v45 = vand.u32 3, %v263_v43  ;;  %vm165_vm9 = vcmp.eq.s32.totalorder %v160_v44, 2  ;;  %vm162_vm11 = vcmp.eq.s32.totalorder %v160_v44, 0 }
  0xd1   :  { %vm161_vm13 = vcmp.lt.s32.totalorder %v160_v44, 2 }
  0xd2   :  { %v135_v20 = vclz %v587_v18  ;;  %vm269_vm10 = vcmp.eq.s32.totalorder %v264_v45, 2  ;;  %vm266_vm12 = vcmp.eq.s32.totalorder %v264_v45, 0  ;;  %vm265_vm14 = vcmp.lt.s32.totalorder %v264_v45, 2 }
  0xd4   :  { %v588_v21 = vadd.s32 4294967294, %v135_v20 }
  0xd6   :  { %vm589_vm6 = vcmp.lt.s32.totalorder %v588_v21, 0 }
  0xd7   :  { %v138_v23 = vsel %vm589_vm6, 0, %v588_v21 }
  0xd8   :  { %v139_v26 = vsub.s32 32, %v138_v23  ;;  %v143_v27 = vsub.s32 4294967266, %v138_v23  ;;  %v140_v28 = vshll.u32 %v131_v16, %v138_v23 }
  0xda   :  { %v141_v29 = vshrl.u32 %v123_v25, %v139_v26  ;;  %v144_v30 = vadd.s32 127, %v143_v27 }
  0xdc   :  { %v142_v31 = vor.u32 %v141_v29, %v140_v28  ;;  %v145_v32 = vshll.u32 %v144_v30, 23 }
  0xde   :  { %v146_v33 = vor.u32 4788187, %v145_v32  ;;  %v149_v35 = vcvt.s32.f32 %v142_v31 }
  0xe0   :  { %v147_v34 = vand.u32 2147483647, %v146_v33 }
  0xe2   :  { %v150_v36 = vmul.f32 %v149_v35, %v147_v34 }
  0xe4   :  { %v151_v38 = vxor.u32 2147483648, %v150_v36 }
  0xe6   :  { %v152_v39 = vsel %vm69_vm7, %v151_v38, %v150_v36 }
  0xe7   :  { %v155_v41 = vsel %vm68_vm8, %v873_v22, %v152_v39  ;;  %v710_v22 = vld [vmem:[#allocation5 + $0x20] sm:$0xff]  }
  0xe8   :  { %714 = vcosq.f32 %v155_v41  ;;  %660 = vmatpush3.bf16.msra.mxu1 %v710_v22 }
  0xe9   :  { %716 = vsinq.f32 %v155_v41  ;;  %661 = vmatprep.subr.bf16.mxu1 %v797_v19 }
  0xec   :  { %662 = vmatpush3.bf16.msra.mxu1 %v711_v62 }
  0xed   :  { %663 = vmatprep.subr.bf16.mxu1 %v797_v19 }
  0xf0   :  { %664 = vmatpush3.bf16.msra.mxu1 %v712_v63 }
  0xf1   :  { %665 = vmatprep.subr.bf16.mxu1 %v797_v19  ;;  %v611_v19 = vld [vmem:[%s924_s5] ss:$0 sm:$0xff] }
  0xf2   :  { %v715_v46 = vpop.eup %714 }
  0xf3   :  { %v717_v47 = vpop.eup %716  ;;  %v166_v48 = vxor.u32 2147483648, %v715_v46 }
  0xf4   :  { %v163_v49 = vxor.u32 2147483648, %v717_v47  ;;  %666 = vmatpush3.bf16.msra.mxu1 %v713_v0 }
  0xf5   :  { %v167_v50 = vsel %vm165_vm9, %v166_v48, %v717_v47  ;;  %v271_v24 = vsel %vm269_vm10, %v166_v48, %v717_v47 }
  0xf6   :  { %v164_v51 = vsel %vm162_vm11, %v715_v46, %v163_v49  ;;  %v268_v52 = vsel %vm266_vm12, %v715_v46, %v163_v49 }
  0xf7   :  { %v168_v53 = vsel %vm161_vm13, %v164_v51, %v167_v50  ;;  %v272_v54 = vsel %vm265_vm14, %v268_v52, %v271_v24 }
  0xf8   :  { %v169_v55 = vsel %vm159_vm15, nan, %v168_v53  ;;  %v273_v56 = vsel %vm159_vm15, nan, %v272_v54 }
  0xf9   :  { %v274_v57 = vpack.c.bf16 %v169_v55, %v169_v55  ;;  %v275_v58 = vpack.c.bf16 %v273_v56, %v273_v56 }
  0xfb   :  { %443 = vmatprep.mubr.bf16.mxu0 %v275_v58 }
  0xfc   :  { %444 = vmatmul.mubr.bf16.vlgmr.msra.gmra.mrb[0].mxu0 %v274_v57 }
 0x1cf   :  { %v636_v1 = vpop.f32.mrb[0].mxu0 }
 0x1d0   :  { %v637_v3 = vpop.f32.mrb[1].mxu0 }
 0x1d1   :  { %v638_v4 = vadd.f32 %v637_v3, %v636_v1  ;;  %v639_v5 = vpop.f32.mrb[2].mxu0 }
 0x1d2   :  { %v640_v6 = vpop.f32.mrb[3].mxu0 }
 0x1d3   :  { %v446_v7 = vadd.f32 %v638_v4, %v594_v2 }
 0x1d5   :  { %v451_v8 = vmul.f32 0.5, %v446_v7 }
 0x1d7   :  { %718 = vtanh.f32 %v451_v8 }
 0x1e1   :  { %v719_v9 = vpop.eup %718 }
 0x1e2   :  { %v453_v10 = vmul.f32 0.5, %v719_v9 }
 0x1e4   :  { %v454_v11 = vadd.f32 0.5, %v453_v10 }
 0x1e6   :  { %v455_v12 = vmul.f32 %v454_v11, %v446_v7 }
 0x1e8   :  { %v456_v13 = vpack.c.bf16 %v455_v12, %v455_v12 }
 0x1ea   :  { %668 = vmatmul.mubr.bf16.vlgmr.msra.gmra.mrb[0].mxu1 %v456_v13 }
 0x2bd   :  { %v562_v14 = vpop.f32.mrb[0].mxu1 }
 0x2be   :  { %v563_v15 = vadd.f32 %v611_v19, %v562_v14  ;;  %v669_v16 = vpop.f32.mrb[1].mxu1 }
 0x2bf   :  { %v565_v17 = vpop.f32.mrb[2].mxu1 }
 0x2c0   :  { %568 = vst [vmem:[#allocation7] sm:$0xff] %v563_v15  ;;  %v670_v18 = vpop.f32.mrb[3].mxu1 }
 0x2c1   :  { %775 = shalt.err (!%p772_p6)
}
 0x2c2   :  { %s776_s5 = scalar_lea.hbm %s925_s6, 128 }
 0x2c3   :  { %p777_p7 = scmp.ne.s32.totalorder %s925_s6, %s776_s5  ;;  %p780_p8 = scmp.lt.u32.totalorder %s776_s5, %s925_s6 }
 0x2c5   :  { %p782_p9 = pnand %p780_p8, %p777_p7 }
 0x2c7   :  { %785 = shalt.err (!%p782_p9)
}
 0x2c8   :  { %578 = dma.vmem_to_hbm [thread:$0]  %s576_s28, 128, %s925_s6, [#allocation4]  }
 0x2c9   :  { %790 = dma.done.wait [#allocation4], 128  }
 0x2ca   :  { %791 = vsyncadd [#allocation4], 4294967168 }
 0x2cb   :  { %582 = vsyncpa [#allocation3], 1 }
 0x2cc   :  { %583 = vsyncpa [#allocation6], 1 }
 0x2cd   :  { %584 = vsyncpa [#allocation4], 1 }

</bundles_post_ra>
